<compile_context>
chip_gen: v7x
topology: tpu7x:2x2x1
jax: 0.10.0
libtpu: 0.0.40
codegen_flags: <defaults>
</compile_context>

<pallas_src>
import functools

import jax
import jax.numpy as jnp
from jax.experimental import pallas as pl
from jax.experimental.pallas import tpu as pltpu

_LANE_WIDTH = 512          # lane-dense last dim: 4 * 128 lanes (f32)
_MIN_PALLAS_ELEMS = 4096   # below this the pallas_call dispatch overhead wins


def _round_up(n, m):
    return ((n + m - 1) // m) * m


def _round_down(n, m):
    return (n // m) * m


@functools.lru_cache(maxsize=1)
def _chip_tile_config():
    """Pick (max_block_rows, vmem_limit_bytes) from the chip's VMEM capacity.

    v5e / v6e: 128 MiB physical VMEM -> 8 MiB f32 tiles, 64 MiB scoped limit.
    v7x:        64 MiB physical VMEM -> 4 MiB f32 tiles, 32 MiB scoped limit.
    """
    vmem_bytes = 64 * 1024 * 1024  # conservative default (v7x-sized)
    try:
        info = pltpu.get_tpu_info()
        vmem_bytes = int(getattr(info, "vmem_capacity_bytes", vmem_bytes))
    except Exception:
        pass
    if vmem_bytes >= 100 * 1024 * 1024:
        return 4096, 64 * 1024 * 1024      # 8 MiB tiles (v5e / v6e)
    return 2048, 32 * 1024 * 1024          # 4 MiB tiles (v7x)


def _choose_block_rows(rows, max_block_rows):
    """Biggest tile that still leaves >= 4 grid steps (2 per TC on v7x)."""
    if rows <= 8:
        return rows                        # single block (full-dim exception)
    quarter = _round_down(rows // 4, 8)    # keep the grid >= ~4 steps
    return min(max_block_rows, max(8, quarter))


def _linreg_kernel(w_ref, b_ref, x_ref, o_ref):
    # w_ref, b_ref: SMEM refs of shape (1,), f32 scalar parameters.
    # x_ref, o_ref: VMEM refs of shape (block_rows, 512).
    w = w_ref[0]
    b = b_ref[0]
    o_ref[...] = (w * x_ref[...] + b).astype(o_ref.dtype)   # fused VPU FMA


def _run_pallas(x2d, w, b):
    rows, _ = x2d.shape
    max_block_rows, vmem_limit = _chip_tile_config()
    block_rows = _choose_block_rows(rows, max_block_rows)
    grid = (pl.cdiv(rows, block_rows),)    # boundary block handled by Pallas

    return pl.pallas_call(
        _linreg_kernel,
        out_shape=jax.ShapeDtypeStruct(x2d.shape, x2d.dtype),
        grid=grid,
        in_specs=[
            pl.BlockSpec(memory_space=pltpu.MemorySpace.SMEM),   # weights (1,)
            pl.BlockSpec(memory_space=pltpu.MemorySpace.SMEM),   # bias (1,)
            pl.BlockSpec((block_rows, _LANE_WIDTH), lambda i: (i, 0)),
        ],
        out_specs=pl.BlockSpec((block_rows, _LANE_WIDTH), lambda i: (i, 0)),
        compiler_params=pltpu.CompilerParams(
            dimension_semantics=("parallel",),   # shard grid across TCs (v7x)
            vmem_limit_bytes=vmem_limit,
        ),
        cost_estimate=pl.CostEstimate(
            flops=2 * x2d.size,
            transcendentals=0,
            bytes_accessed=2 * x2d.size * x2d.dtype.itemsize,
        ),
    )(w, b, x2d)


def linear_regression_forward(x, weights, bias, *, force_pallas=False):
    """y = weights * x + bias, computed in a Pallas TPU kernel.

    x:       f32[...]   (any shape; the PyTorch module uses (N, 1))
    weights: f32[1]
    bias:    f32[1]
    returns: same shape/dtype as x
    """
    n = x.size
    # Keep the SMEM scalars 32-bit regardless of x's dtype.
    w = weights.reshape(1).astype(jnp.float32)
    b = bias.reshape(1).astype(jnp.float32)

    aligned = n > 0 and (n % _LANE_WIDTH == 0)

    if not force_pallas and (not aligned or n < _MIN_PALLAS_ELEMS):
        # Tiny or lane-unaligned inputs: a fused XLA elementwise op avoids both
        # the pallas dispatch overhead and any pad/slice HBM copies, which
        # dominate this bandwidth-bound op.
        return (weights * x + bias).astype(x.dtype)

    if aligned:
        # Zero-copy path: metadata-only reshape into a lane-dense slab; no
        # padding in, no slicing out.  Uneven row counts are handled by the
        # grid's boundary-block masking.
        x2d = x.reshape(-1, _LANE_WIDTH)
        y2d = _run_pallas(x2d, w, b)
        return y2d.reshape(x.shape)

    # force_pallas on an unaligned input (test/demo path only): pad the flat
    # vector up to full lanes / sublanes.  This is the only path that
    # materializes a padded copy, and it is never taken implicitly.
    rows = _round_up(max(8, pl.cdiv(n, _LANE_WIDTH)), 8)
    padded = rows * _LANE_WIDTH
    x2d = jnp.pad(x.reshape(-1), (0, padded - n)).reshape(rows, _LANE_WIDTH)
    y2d = _run_pallas(x2d, w, b)
    return y2d.reshape(-1)[:n].reshape(x.shape)


if __name__ == "__main__":
    # Deterministic parameter init (mirrors torch.randn(1) for weights & bias).
    key = jax.random.PRNGKey(0)
    k_w, k_b, k_x = jax.random.split(key, 3)
    weights = jax.random.normal(k_w, (1,), dtype=jnp.float32)
    bias = jax.random.normal(k_b, (1,), dtype=jnp.float32)

    # 1) The reference script's input: X = torch.arange(0, 1, 0.01).unsqueeze(1)
    #    (100, 1) is lane-unaligned, so force the Pallas (padded) path to make
    #    sure the kernel itself is exercised and validated.
    x_small = jnp.arange(0.0, 1.0, 0.01, dtype=jnp.float32)[:, None]   # (100, 1)
    y_small = jax.block_until_ready(
        linear_regression_forward(x_small, weights, bias, force_pallas=True))
    y_small_ref = weights * x_small + bias
    assert y_small.shape == (100, 1) and y_small.dtype == jnp.float32
    assert jnp.allclose(y_small, y_small_ref, atol=1e-6, rtol=1e-6)

    # 2) A lane-aligned input exercising the zero-copy, multi-step pipelined
    #    grid: 65536 elems -> (128, 512) slab -> 4 "parallel" grid steps of
    #    (32, 512) tiles (no pad copy, no output slice copy).
    x_big = jax.random.normal(k_x, (65536, 1), dtype=jnp.float32)
    y_big = jax.block_until_ready(
        linear_regression_forward(x_big, weights, bias))
    y_big_ref = weights * x_big + bias
    assert y_big.shape == x_big.shape and y_big.dtype == jnp.float32
    assert jnp.allclose(y_big, y_big_ref, atol=1e-6, rtol=1e-6)

    print("KERNEL_OK")
</pallas_src>

<mosaic_0001>
module attributes {stable_mosaic.version = 11 : i64} {
  func.func @_linreg_kernel(%arg0: i32, %arg1: memref<1xf32, #tpu.memory_space<smem>>, %arg2: memref<1xf32, #tpu.memory_space<smem>>, %arg3: memref<8x512xf32, #tpu.memory_space<vmem>>, %arg4: memref<8x512xf32, #tpu.memory_space<vmem>>) attributes {dimension_semantics = [#tpu.dimension_semantics<parallel>], iteration_bounds = array<i64: 1>, scalar_prefetch = 0 : i64, scratch_operands = 0 : i64, tpu.core_type = #tpu.core_type<tc>, window_params = [{transform_indices = @transform_0, window_bounds = array<i64: 1>}, {transform_indices = @transform_1, window_bounds = array<i64: 1>}, {transform_indices = @transform_2, window_bounds = array<i64: 8, 512>}, {transform_indices = @transform_3, window_bounds = array<i64: 8, 512>}]} {
    %c0 = arith.constant 0 : index
    %0 = memref.load %arg1[%c0] : memref<1xf32, #tpu.memory_space<smem>>
    %c0_0 = arith.constant 0 : index
    %1 = memref.load %arg2[%c0_0] : memref<1xf32, #tpu.memory_space<smem>>
    %c0_1 = arith.constant 0 : index
    %c0_2 = arith.constant 0 : index
    %2 = vector.load %arg3[%c0_1, %c0_2] : memref<8x512xf32, #tpu.memory_space<vmem>>, vector<8x512xf32>
    %3 = vector.broadcast %0 : f32 to vector<8x512xf32>
    %4 = arith.mulf %3, %2 : vector<8x512xf32>
    %5 = vector.broadcast %1 : f32 to vector<8x512xf32>
    %6 = arith.addf %4, %5 : vector<8x512xf32>
    %c0_3 = arith.constant 0 : index
    %c0_4 = arith.constant 0 : index
    %7 = vector.load %arg4[%c0_3, %c0_4] : memref<8x512xf32, #tpu.memory_space<vmem>>, vector<8x512xf32>
    tpu.vector_store %arg4[%c0_3, %c0_4], %6 {strides = array<i32>} : memref<8x512xf32, #tpu.memory_space<vmem>>, vector<8x512xf32>,
    return
  }
  func.func @transform_0(%arg0: i32) -> i32 {
    %c0_i32 = arith.constant 0 : i32
    %c0_i32_0 = arith.constant 0 : i32
    return %c0_i32 : i32
  }
  func.func @transform_1(%arg0: i32) -> i32 {
    %c0_i32 = arith.constant 0 : i32
    %c0_i32_0 = arith.constant 0 : i32
    return %c0_i32 : i32
  }
  func.func @transform_2(%arg0: i32) -> (i32, i32) {
    %c0_i32 = arith.constant 0 : i32
    %c0_i32_0 = arith.constant 0 : i32
    return %arg0, %c0_i32 : i32, i32
  }
  func.func @transform_3(%arg0: i32) -> (i32, i32) {
    %c0_i32 = arith.constant 0 : i32
    %c0_i32_0 = arith.constant 0 : i32
    return %arg0, %c0_i32 : i32, i32
  }
}

</mosaic_0001>

<bundles_post_ra>
// kernel: tpu_custom_call.1
= control target key start
LH: loop header
LB: loop body
LE: loop exit
PB: predicated region body
PF: predicated region fallthrough
CT: control target
= control target key end

     0   :  { %10 = vsyncpa [#allocation5], 0  ;;  %s166_s0 = inlined_call_operand.<no memory space> [shape: f32[1], index: 0, kind: input, shape index: {}]   ;;  %s167_s1 = inlined_call_operand.<no memory space> [shape: f32[1], index: 1, kind: input, shape index: {}]   ;;  %s168_s2 = inlined_call_operand.hbm [shape: f32[8,512], index: 2, kind: input, shape index: {}]   ;;  %s169_s3 = inlined_call_operand.hbm [shape: f32[8,512], index: 3, kind: output, shape index: {}]  }
   0x1   :  { %11 = vsyncpa [#allocation6], 0  ;;  %s114_s12 = smov [#allocation4]   ;;  %s66_s16 = scalar_lea.hbm %s168_s2, 512 }
   0x2   :  { %s22_s13 = sshll.u32 %s114_s12, 4  ;;  %p67_p0 = scmp.ne.s32.totalorder %s168_s2, %s66_s16  ;;  %s23_s13 = int_to_ptr.vmem [resolvable:$true] %s22_s13 }
   0x3   :  { %p70_p1 = scmp.lt.u32.totalorder %s66_s16, %s168_s2 }
   0x5   :  { %p72_p2 = pnand %p70_p1, %p67_p0 }
   0x7   :  { %75 = shalt.err (!%p72_p2)
}
   0x8   :  { %s76_s21 = scalar_lea.vmem %s23_s13, 512  ;;  %p81_p4 = scmp.lt.s32.totalorder %s23_s13, %s23_s13 }
   0x9   :  { %p77_p3 = scmp.ne.s32.totalorder %s23_s13, %s76_s21  ;;  %p82_p5 = scmp.lt.s32.totalorder %s76_s21, %s76_s21 }
   0xb   :  { %p83_p6 = por %p82_p5, %p81_p4 }
   0xd   :  { %p84_p7 = pnand %p83_p6, %p77_p3 }
   0xf   :  { %87 = shalt.err (!%p84_p7)
}
  0x10   :  { %25 = dma.hbm_to_vmem [thread:$0]  %s168_s2, 512, %s23_s13, [#allocation5]  }
  0x11   :  { %110 = dma.done.wait [#allocation5], 512  }
  0x12   :  { %111 = vsyncadd [#allocation5], 4294966784  ;;  %v35_v0 = vstv %s166_s0  ;;  %v31_v1 = vld [vmem:[#allocation4] sm:$0xff]  ;;  %v40_v2 = vstv %s167_s1  ;;  %v32_v3 = vld [vmem:[#allocation4 + $0x8] sm:$0xff]  ;;  %s115_s28 = smov [#allocation7]  }
  0x13   :  { %v33_v4 = vld [vmem:[#allocation4 + $0x10] sm:$0xff]  ;;  %v36_v5 = vmul.f32 %v35_v0, %v31_v1  ;;  %v37_v6 = vmul.f32 %v35_v0, %v32_v3  ;;  %v34_v8 = vld [vmem:[#allocation4 + $0x18] sm:$0xff]  ;;  %s55_s29 = sshll.u32 %s115_s28, 4  ;;  %s56_s29 = int_to_ptr.vmem [resolvable:$true] %s55_s29 }
  0x14   :  { %v38_v7 = vmul.f32 %v35_v0, %v33_v4  ;;  %v39_v9 = vmul.f32 %v35_v0, %v34_v8  ;;  %s88_s0 = scalar_lea.vmem %s56_s29, 512  ;;  %p93_p9 = scmp.lt.s32.totalorder %s56_s29, %s56_s29 }
  0x15   :  { %v41_v10 = vadd.f32 %v40_v2, %v36_v5  ;;  %v42_v11 = vadd.f32 %v40_v2, %v37_v6  ;;  %p89_p8 = scmp.ne.s32.totalorder %s56_s29, %s88_s0  ;;  %p94_p10 = scmp.lt.s32.totalorder %s88_s0, %s88_s0 }
  0x16   :  { %v43_v12 = vadd.f32 %v40_v2, %v38_v7  ;;  %v44_v13 = vadd.f32 %v40_v2, %v39_v9 }
  0x17   :  { %45 = vst [vmem:[#allocation7] sm:$0xff] %v41_v10  ;;  %46 = vst [vmem:[#allocation7 + $0x8] sm:$0xff] %v42_v11  ;;  %p95_p11 = por %p94_p10, %p93_p9 }
  0x18   :  { %47 = vst [vmem:[#allocation7 + $0x10] sm:$0xff] %v43_v12  ;;  %48 = vst [vmem:[#allocation7 + $0x18] sm:$0xff] %v44_v13 }
  0x19   :  { %p96_p12 = pnand %p95_p11, %p89_p8 }
  0x1b   :  { %99 = shalt.err (!%p96_p12)
}
  0x1c   :  { %s100_s30 = scalar_lea.hbm %s169_s3, 512 }
  0x1d   :  { %p101_p13 = scmp.ne.s32.totalorder %s169_s3, %s100_s30  ;;  %p104_p0 = scmp.lt.u32.totalorder %s100_s30, %s169_s3 }
  0x1f   :  { %p106_p1 = pnand %p104_p0, %p101_p13 }
  0x21   :  { %109 = shalt.err (!%p106_p1)
}
  0x22   :  { %58 = dma.vmem_to_hbm [thread:$0]  %s56_s29, 512, %s169_s3, [#allocation6]  }
  0x23   :  { %112 = dma.done.wait [#allocation6], 512  }
  0x24   :  { %113 = vsyncadd [#allocation6], 4294966784 }
  0x25   :  { %62 = vsyncpa [#allocation5], 1 }
  0x26   :  { %63 = vsyncpa [#allocation6], 1 }

</bundles_post_ra>
